<compile_context>
chip_gen: v6e
topology: v6e:2x2x1
jax: 0.10.0
libtpu: 0.0.40
codegen_flags: <defaults>
</compile_context>

<pallas_src>
import functools

import jax
import jax.numpy as jnp
from jax.experimental import pallas as pl
from jax.experimental.pallas import tpu as pltpu


def _normalize_kernel(img_ref, scale_ref, shift_ref, out_ref, *, block_rows):
    # img_ref / out_ref  : (block_rows, block_cols) VMEM tiles.
    # scale_ref/shift_ref: full (NC_pad, 1) columns, resident in VMEM
    #                      (constant index_map -> copied once, sliced here).
    r0 = pl.program_id(0) * block_rows
    if block_rows % 8 == 0:
        r0 = pl.multiple_of(r0, 8)
    rows = pl.ds(r0, block_rows)
    out_ref[...] = img_ref[...] * scale_ref[rows, :] + shift_ref[rows, :]


def _per_block_target_bytes():
    """Generation-aware per-input-block byte target."""
    try:
        vmem = pltpu.get_tpu_info().vmem_capacity_bytes
    except Exception:  # unknown chip / interpret mode
        return 4 << 20
    # Keep 2 x (in + out) pipeline buffers around half of physical VMEM:
    #   v7x (64 MiB)      -> 8 MiB blocks (~32 MiB of buffers)
    #   v5e/v6e (128 MiB) -> 8 MiB blocks
    return int(max(2 << 20, min(8 << 20, vmem // 8)))


def _choose_blocks(nc, hw, itemsize, target_bytes, min_row_steps=4):
    """Pick (block_rows, block_cols) for the (NC, HW) slab.

    Rules:
      * last block dim multiple of 128 (or == HW)  -> unmasked vst
      * second-to-last multiple of 8 (or == NC)    -> sublane constraint
      * tile HW when even 8 full rows exceed the byte budget (large images)
      * block_rows prefers an exact divisor of NC (no masked tail block)
      * row blocks capped so the grid has >= min_row_steps steps when that
        keeps blocks >= ~512 KiB (v7x megacore sharding + pipelining)
    """
    row_bytes = hw * itemsize
    base_rows = nc if nc <= 8 else 8

    # Large images: tile HW (multiples of 128) instead of blowing up VMEM.
    if base_rows * row_bytes > target_bytes and hw > 128:
        cols = (target_bytes // (base_rows * itemsize)) // 128 * 128
        cols = max(128, min(cols, (hw // 128) * 128))
        # Prefer an exact divisor of HW among multiples of 128 (no masked tail).
        for d in range(cols, 127, -128):
            if hw % d == 0:
                cols = d
                break
        return base_rows, cols

    if nc <= 8:
        return nc, hw

    # Full-width rows: grow block_rows toward the byte budget.
    max_rows = min(nc, max(base_rows, target_bytes // max(row_bytes, 1)))

    # Keep >= min_row_steps grid steps unless blocks would drop below ~512 KiB.
    cap_rows = -(-nc // min_row_steps)          # cdiv
    cap_rows = max(8, (cap_rows // 8) * 8)
    if cap_rows * row_bytes >= (512 << 10):
        max_rows = min(max_rows, cap_rows)

    if max_rows >= nc:
        return nc, hw

    # Largest multiple-of-8 divisor of NC not exceeding max_rows.
    r = (max_rows // 8) * 8
    while r >= 8:
        if nc % r == 0:
            return r, hw
        r -= 8
    # No exact divisor: accept a (correct, slightly masked) tail block.
    return max(8, (max_rows // 8) * 8), hw


def normalization_forward(img, mean, std):
    """Pallas equivalent of Normalization.forward.

    img : (N, C, H, W) float32
    mean: (C,) float32
    std : (C,) float32
    """
    N, C, H, W = img.shape
    assert mean.shape == (C,) and std.shape == (C,)

    NC, HW = N * C, H * W
    itemsize = jnp.dtype(img.dtype).itemsize

    # Free view for contiguous NCHW data: lane-dense 2-D slab.
    img2 = img.reshape(NC, HW)

    # Exact scale/shift precompute: (x - m) / s == x * (1/s) + (-m/s).
    scale = (1.0 / std).astype(img.dtype)            # (C,)
    shift = (-mean * scale).astype(img.dtype)        # (C,)
    scale_rows = jnp.tile(scale, N).reshape(NC, 1)   # (N*C, 1)
    shift_rows = jnp.tile(shift, N).reshape(NC, 1)   # (N*C, 1)

    target_bytes = _per_block_target_bytes()
    block_rows, block_cols = _choose_blocks(NC, HW, itemsize, target_bytes)

    n_row_blocks = pl.cdiv(NC, block_rows)
    n_col_blocks = pl.cdiv(HW, block_cols)
    grid = (n_row_blocks, n_col_blocks)

    # Pad the resident scale/shift columns so the in-kernel pl.ds slice of the
    # last row block never reads past the allocation (padded output rows are
    # discarded by Pallas on writeback, so the pad values are irrelevant).
    NC_pad = n_row_blocks * block_rows
    if NC_pad != NC:
        pad = NC_pad - NC
        scale_rows = jnp.pad(scale_rows, ((0, pad), (0, 0)))
        shift_rows = jnp.pad(shift_rows, ((0, pad), (0, 0)))

    # Explicit VMEM budget: 2 pipeline buffers each for the input and output
    # blocks + resident scale/shift + ~25% slack for internal scratch.
    block_bytes = block_rows * block_cols * itemsize
    const_bytes = 2 * NC_pad * itemsize
    vmem_limit = int((4 * block_bytes + const_bytes) * 1.25) + (2 << 20)
    vmem_limit = max(vmem_limit, 32 << 20)   # never below any default limit

    kernel = functools.partial(_normalize_kernel, block_rows=block_rows)

    out2 = pl.pallas_call(
        kernel,
        out_shape=jax.ShapeDtypeStruct((NC, HW), img.dtype),
        grid_spec=pltpu.PrefetchScalarGridSpec(
            num_scalar_prefetch=0,
            grid=grid,
            in_specs=[
                pl.BlockSpec((block_rows, block_cols), lambda i, j: (i, j)),
                pl.BlockSpec((NC_pad, 1), lambda i, j: (0, 0)),   # resident
                pl.BlockSpec((NC_pad, 1), lambda i, j: (0, 0)),   # resident
            ],
            out_specs=pl.BlockSpec((block_rows, block_cols), lambda i, j: (i, j)),
        ),
        compiler_params=pltpu.CompilerParams(
            dimension_semantics=("parallel", "parallel"),
            vmem_limit_bytes=vmem_limit,
        ),
    )(img2, scale_rows, shift_rows)

    return out2.reshape(N, C, H, W)


if __name__ == "__main__":
    # Deterministic setup: small shapes consistent with the module.
    N, C, H, W = 2, 4, 16, 16

    key = jax.random.PRNGKey(0)
    img = jax.random.uniform(key, (N, C, H, W), dtype=jnp.float32)

    # Deterministic per-channel mean/std (what the module __init__ would get).
    mean = jnp.array([0.485, 0.456, 0.406, 0.5], dtype=jnp.float32)
    std = jnp.array([0.229, 0.224, 0.225, 0.25], dtype=jnp.float32)

    out = normalization_forward(img, mean, std)
    out = jax.block_until_ready(out)

    # Reference in plain JAX (matches PyTorch broadcasting of (C,1,1)).
    # Fused scale/shift form differs from (x - m) / s by a few f32 ULPs.
    ref = (img - mean[None, :, None, None]) / std[None, :, None, None]
    assert jnp.allclose(out, ref, atol=1e-5, rtol=1e-5), "mismatch vs reference"

    print("KERNEL_OK")
</pallas_src>

<mosaic_0001>
module attributes {stable_mosaic.version = 11 : i64} {
  func.func @_normalize_kernel(%arg0: i32, %arg1: i32, %arg2: memref<8x256xf32, #tpu.memory_space<vmem>>, %arg3: memref<8x1xf32, #tpu.memory_space<vmem>>, %arg4: memref<8x1xf32, #tpu.memory_space<vmem>>, %arg5: memref<8x256xf32, #tpu.memory_space<vmem>>) attributes {dimension_semantics = [#tpu.dimension_semantics<parallel>, #tpu.dimension_semantics<parallel>], iteration_bounds = array<i64: 1, 1>, scalar_prefetch = 0 : i64, scratch_operands = 0 : i64, tpu.core_type = #tpu.core_type<tc>, window_params = [{transform_indices = @transform_0, window_bounds = array<i64: 8, 256>}, {pipeline_mode = #tpu.pipeline_mode<synchronous>, transform_indices = @transform_1, window_bounds = array<i64: 8, 1>}, {pipeline_mode = #tpu.pipeline_mode<synchronous>, transform_indices = @transform_2, window_bounds = array<i64: 8, 1>}, {transform_indices = @transform_3, window_bounds = array<i64: 8, 256>}]} {
    %c8_i32 = arith.constant 8 : i32
    %0 = arith.muli %arg0, %c8_i32 : i32
    %1 = tpu.assume_multiple %0, 8 : i32
    %c0 = arith.constant 0 : index
    %c0_0 = arith.constant 0 : index
    %2 = vector.load %arg2[%c0, %c0_0] : memref<8x256xf32, #tpu.memory_space<vmem>>, vector<8x256xf32>
    %3 = arith.index_cast %1 : i32 to index
    %c0_1 = arith.constant 0 : index
    %4 = vector.load %arg3[%3, %c0_1] : memref<8x1xf32, #tpu.memory_space<vmem>>, vector<8x1xf32>
    %5 = vector.broadcast %4 : vector<8x1xf32> to vector<8x256xf32>
    %6 = arith.mulf %2, %5 : vector<8x256xf32>
    %7 = arith.index_cast %1 : i32 to index
    %c0_2 = arith.constant 0 : index
    %8 = vector.load %arg4[%7, %c0_2] : memref<8x1xf32, #tpu.memory_space<vmem>>, vector<8x1xf32>
    %9 = vector.broadcast %8 : vector<8x1xf32> to vector<8x256xf32>
    %10 = arith.addf %6, %9 : vector<8x256xf32>
    %c0_3 = arith.constant 0 : index
    %c0_4 = arith.constant 0 : index
    %11 = vector.load %arg5[%c0_3, %c0_4] : memref<8x256xf32, #tpu.memory_space<vmem>>, vector<8x256xf32>
    tpu.vector_store %arg5[%c0_3, %c0_4], %10 {strides = array<i32>} : memref<8x256xf32, #tpu.memory_space<vmem>>, vector<8x256xf32>,
    return
  }
  func.func @transform_0(%arg0: i32, %arg1: i32) -> (i32, i32) {
    %c0_i32 = arith.constant 0 : i32
    return %arg0, %arg1 : i32, i32
  }
  func.func @transform_1(%arg0: i32, %arg1: i32) -> (i32, i32) {
    %c0_i32 = arith.constant 0 : i32
    %c0_i32_0 = arith.constant 0 : i32
    %c0_i32_1 = arith.constant 0 : i32
    return %c0_i32, %c0_i32_0 : i32, i32
  }
  func.func @transform_2(%arg0: i32, %arg1: i32) -> (i32, i32) {
    %c0_i32 = arith.constant 0 : i32
    %c0_i32_0 = arith.constant 0 : i32
    %c0_i32_1 = arith.constant 0 : i32
    return %c0_i32, %c0_i32_0 : i32, i32
  }
  func.func @transform_3(%arg0: i32, %arg1: i32) -> (i32, i32) {
    %c0_i32 = arith.constant 0 : i32
    return %arg0, %arg1 : i32, i32
  }
}

</mosaic_0001>

<bundles_post_ra>
// kernel: tpu_custom_call.1
= control target key start
LH: loop header
LB: loop body
LE: loop exit
PB: predicated region body
PF: predicated region fallthrough
CT: control target
= control target key end

     0   :  { %v77_v1 = vmov 0   ;;  %s114_s0 = inlined_call_operand.vmem [shape: f32[8,256], index: 0, kind: input, shape index: {}]   ;;  %s115_s1 = inlined_call_operand.vmem [shape: f32[8,1], index: 1, kind: input, shape index: {}]   ;;  %s116_s2 = inlined_call_operand.vmem [shape: f32[8,1], index: 2, kind: input, shape index: {}]   ;;  %s117_s3 = inlined_call_operand.hbm [shape: f32[8,256], index: 3, kind: output, shape index: {}]  }
   0x1   :  { %v19_v0 = vld [vmem:[%s115_s1] sm:$0xff]  ;;  %54 = vset.pattern.permute.xlu0 %v77_v1 }
   0x2   :  { %8 = vsyncpa [#allocation3], 0  ;;  %22 = vperm.xlu0 %54, %v19_v0   ;;  %v28_v2 = vld [vmem:[%s116_s2] sm:$0xff]  ;;  %v17_v5 = vld [vmem:[%s114_s0 + $0x8] sm:$0xff]  ;;  %s78_s20 = smov [#allocation2]  }
   0x3   :  { %v16_v4 = vld [vmem:[%s114_s0] sm:$0xff]  ;;  %s44_s1 = sshll.u32 %s78_s20, 4  ;;  %s45_s1 = int_to_ptr.vmem [resolvable:$true] %s44_s1 }
   0x4   :  { %s55_s2 = scalar_lea.vmem %s45_s1, 256  ;;  %p60_p1 = scmp.lt.s32.totalorder %s45_s1, %s45_s1 }
   0x5   :  { %p56_p0 = scmp.ne.s32.totalorder %s45_s1, %s55_s2  ;;  %p61_p2 = scmp.lt.s32.totalorder %s55_s2, %s55_s2 }
   0x6   :  { %31 = vperm.xlu0 %54, %v28_v2  }
   0x7   :  { %p62_p3 = por %p61_p2, %p60_p1 }
   0x9   :  { %p63_p4 = pnand %p62_p3, %p56_p0 }
  0x7d   :  { %v23_v3 = vpop.permute.xlu0 %22 }
  0x7e   :  { %v25_v6 = vmul.f32 %v23_v3, %v16_v4  ;;  %v26_v7 = vmul.f32 %v23_v3, %v17_v5 }
  0x81   :  { %v32_v8 = vpop.permute.xlu0 %31 }
  0x82   :  { %v34_v9 = vadd.f32 %v32_v8, %v25_v6  ;;  %v35_v10 = vadd.f32 %v32_v8, %v26_v7 }
  0x84   :  { %36 = vst [vmem:[#allocation2] sm:$0xff] %v34_v9  ;;  %37 = vst [vmem:[#allocation2 + $0x8] sm:$0xff] %v35_v10 }
  0x85   :  { %66 = shalt.err (!%p63_p4)
}
  0x86   :  { %47 = dma.vmem_to_hbm [thread:$0]  %s45_s1, 256, %s117_s3, [#allocation3]  }
  0x87   :  { %75 = dma.done.wait [#allocation3], 256  }
  0x88   :  { %76 = vsyncadd [#allocation3], 4294967040 }
  0x89   :  { %51 = vsyncpa [#allocation3], 1 }

</bundles_post_ra>
